<compile_context>
chip_gen: v7x
topology: tpu7x:2x2x1
jax: 0.10.0
libtpu: 0.0.40
codegen_flags: <defaults>
</compile_context>

<pallas_src>
import functools
import math

import jax
import jax.numpy as jnp
from jax.experimental import pallas as pl
from jax.experimental.pallas import tpu as pltpu


def _round_up(x, m):
    return (x + m - 1) // m * m


def _vmem_capacity_bytes():
    # Physical VMEM per TensorCore; fall back to the smallest generation (v7x).
    try:
        return int(pltpu.get_tpu_info().vmem_capacity_bytes)
    except Exception:
        return 64 * 1024 * 1024


def _choose_group_size(B, Np, *, target_m=256, min_m=128):
    """Graphs packed per grid step. Targets M = G*Np of `target_m` MXU rows
    (256-row LHS fills v6e/v7x, 128 fills v5e) but keeps >= 2 grid steps when
    that does not drop M below `min_m`, so v7x's 2 TensorCores both get work."""
    G = max(1, min(B, target_m // Np))
    if B > 1 and (B + G - 1) // G <= 1:          # would be a single grid step
        half = (B + 1) // 2
        if half * Np >= min_m:
            G = half
    return G


# --------------------------------------------------------------------------
# Pallas kernel: one grid step processes G graphs packed into M = G*Np rows.
# Shapes seen by the kernel (group dim squeezed away by the BlockSpecs):
#   x_ref   [M, Din]  bf16/f32    agg_ref [M, M]   bf16/f32 (block-diagonal)
#   wio_ref [Din, 2*Hp]           wh_ref  [Hp, Hp]          wom_ref [Hp, Hp]
#   bi/bh/bo [1, Hp] f32          out_ref [M, Hp]
# --------------------------------------------------------------------------
def mpn_encoder_kernel(x_ref, agg_ref, wio_ref, bi_ref, wh_ref, bh_ref,
                       wom_ref, bo_ref, out_ref, *, depth, hp):
    x = x_ref[...]
    agg = agg_ref[...]
    wh = wh_ref[...]
    wom = wom_ref[...]
    mm_dtype = x.dtype

    # Fused K=Din matmul: [x @ W_i | x @ W_o_atom]  (Hp-aligned slices -> free).
    xw = jnp.dot(x, wio_ref[...], preferred_element_type=jnp.float32)  # [M, 2Hp]
    inp = xw[:, :hp] + bi_ref[...]        # input = W_i(init_messages)
    out_atom = xw[:, hp:]                 # atom half of W_o(concat(...))

    inp_bh = inp + bh_ref[...]            # hoisted: b_h broadcast once, not per depth
    message = jnp.maximum(inp, 0.0).astype(mm_dtype)   # relu; carried in bf16

    # message passing: message = relu(input + W_h(sum_k message[a2nei[:,k]]))
    # NOTE: padded atom rows carry message = relu(b_i) != 0, but their columns
    # in `agg` are identically zero (a2nei never indexes >= N; padded graphs
    # have all-zero blocks), so they never contaminate real atoms. Keep this
    # invariant if the a2x mapping / padding convention ever changes.
    def body(_, msg):
        nei = jnp.dot(agg, msg, preferred_element_type=jnp.float32)
        upd = jnp.dot(nei.astype(mm_dtype), wh, preferred_element_type=jnp.float32)
        return jnp.maximum(inp_bh + upd, 0.0).astype(mm_dtype)   # dropout p=0 -> id

    unroll = True if depth <= 9 else 4
    message = jax.lax.fori_loop(0, depth - 1, body, message, unroll=unroll)

    # aggregate_to_atom_fea: a2x = a2nei, atom_fea = init_messages
    a_message = jnp.dot(agg, message, preferred_element_type=jnp.float32)
    out = (out_atom
           + jnp.dot(a_message.astype(mm_dtype), wom,
                     preferred_element_type=jnp.float32)
           + bo_ref[...])
    out_ref[...] = jnp.maximum(out, 0.0).astype(out_ref.dtype)


# --------------------------------------------------------------------------
# Wrapper: batching, padding, block-diagonal aggregation matrix, pallas_call.
# --------------------------------------------------------------------------
def mpn_encoder_forward(init_messages, a2nei, params, depth, *,
                        use_bf16=True, out_dtype=jnp.float32):
    B, N, Din = init_messages.shape
    H = params["W_i"].shape[1]
    Np = _round_up(max(N, 8), 8)          # sublane-aligned atoms per graph
    Hp = _round_up(H, 128)                # lane-aligned hidden size
    cdtype = jnp.bfloat16 if use_bf16 else jnp.float32

    G = _choose_group_size(B, Np)         # graphs packed per grid step
    Bp = _round_up(B, G)                  # pad batch to a multiple of G
    num_groups = Bp // G
    M = G * Np                            # MXU LHS rows per grid step

    # Per-graph aggregation matrix via scatter-add (no one_hot HBM temp):
    #   agg[b,i,j] = #{k : a2nei[b,i,k] == j}, so agg @ f == sum_k f[a2nei[:,k]].
    # Values are small integer counts -> exact in bf16.
    b_idx = jnp.arange(B, dtype=jnp.int32)[:, None, None]
    i_idx = jnp.arange(N, dtype=jnp.int32)[None, :, None]
    agg = jnp.zeros((B, N, N), jnp.float32).at[b_idx, i_idx, a2nei].add(1.0)
    agg = jnp.pad(agg, ((0, Bp - B), (0, Np - N), (0, Np - N)))

    # Block-diagonal matrix per group of G graphs -> one full-width MXU matmul
    # per neighbor sum.
    eye_g = jnp.eye(G, dtype=jnp.float32)
    agg_bd = jnp.einsum("bgij,gh->bgihj", agg.reshape(num_groups, G, Np, Np), eye_g)
    agg_bd = agg_bd.reshape(num_groups, M, M).astype(cdtype)

    x = jnp.pad(init_messages.astype(jnp.float32),
                ((0, Bp - B), (0, Np - N), (0, 0)))
    x = x.reshape(num_groups, M, Din).astype(cdtype)

    def pad2d(w, rows, cols):
        w = w.astype(jnp.float32)
        return jnp.pad(w, ((0, rows - w.shape[0]), (0, cols - w.shape[1])))

    # Fused [W_i | W_o_atom] so both K=Din matmuls on x become one MXU pass.
    wio = jnp.concatenate([pad2d(params["W_i"], Din, Hp),
                           pad2d(params["W_o_atom"], Din, Hp)], axis=1).astype(cdtype)
    wh = pad2d(params["W_h"], Hp, Hp).astype(cdtype)
    wom = pad2d(params["W_o_msg"], Hp, Hp).astype(cdtype)
    bi = pad2d(params["b_i"], 1, Hp)      # biases stay f32 (added post-accumulation)
    bh = pad2d(params["b_h"], 1, Hp)
    bo = pad2d(params["b_o"], 1, Hp)

    # Honest VMEM estimate: Pallas double-buffers every pipelined block,
    # including the constant-index weight blocks.
    isz = 2 if use_bf16 else 4
    osz = jnp.dtype(out_dtype).itemsize
    need = (2 * (M * Din + M * M) * isz               # x, agg   (double-buffered)
            + 2 * M * Hp * osz                        # out      (double-buffered)
            + 2 * (2 * Din * Hp + 2 * Hp * Hp) * isz  # weights  (double-buffered)
            + 2 * 3 * Hp * 4                          # biases
            + 8 * M * Hp * 4)                         # intermediates (rough)
    vmem_limit = None
    if need > 16 * 1024 * 1024:                       # smallest default scoped limit
        vmem_limit = int(min(2 * need, 0.85 * _vmem_capacity_bytes()))

    kernel = functools.partial(mpn_encoder_kernel, depth=depth, hp=Hp)
    per_group = lambda shape: pl.BlockSpec((None,) + shape, lambda g: (g, 0, 0))
    resident = lambda shape: pl.BlockSpec(shape, lambda g: (0, 0))

    out = pl.pallas_call(
        kernel,
        out_shape=jax.ShapeDtypeStruct((num_groups, M, Hp), out_dtype),
        grid=(num_groups,),
        in_specs=[
            per_group((M, Din)),         # x    (G graphs packed per step)
            per_group((M, M)),           # agg  (block-diagonal)
            resident((Din, 2 * Hp)),     # [W_i | W_o_atom]
            resident((1, Hp)),           # b_i
            resident((Hp, Hp)),          # W_h
            resident((1, Hp)),           # b_h
            resident((Hp, Hp)),          # W_o (message half)
            resident((1, Hp)),           # b_o
        ],
        out_specs=per_group((M, Hp)),
        compiler_params=pltpu.CompilerParams(
            dimension_semantics=("parallel",),
            vmem_limit_bytes=vmem_limit),
    )(x, agg_bd, wio, bi, wh, bh, wom, bo)

    return out.reshape(Bp, Np, Hp)[:B, :N, :H]


# --------------------------------------------------------------------------
# Pure-JAX reference (mirrors the PyTorch forward; same operand precision as
# the kernel so the comparison is a direct semantic check).
# --------------------------------------------------------------------------
def _single_graph_reference(x, a2nei, params, depth, cdtype):
    def lin(a, w, b):
        return jnp.dot(a.astype(cdtype), w.astype(cdtype),
                       preferred_element_type=jnp.float32) + b

    def gather_sum(feat, index):
        f = feat.astype(cdtype).astype(jnp.float32)
        return jnp.take(f, index, axis=0).sum(axis=1)

    wo = jnp.concatenate([params["W_o_atom"], params["W_o_msg"]], axis=0)
    inp = lin(x, params["W_i"], params["b_i"])
    message = jax.nn.relu(inp)
    for _ in range(depth - 1):
        nei = gather_sum(message, a2nei)
        message = jax.nn.relu(inp + lin(nei, params["W_h"], params["b_h"]))
    a_message = gather_sum(message, a2nei)
    a_input = jnp.concatenate([x, a_message], axis=1)
    return jax.nn.relu(lin(a_input, wo, params["b_o"]))


def mpn_encoder_reference(init_messages, a2nei, params, depth, *, use_bf16=True):
    cdtype = jnp.bfloat16 if use_bf16 else jnp.float32
    fn = lambda x, idx: _single_graph_reference(x, idx, params, depth, cdtype)
    return jax.vmap(fn)(init_messages.astype(jnp.float32), a2nei)


# --------------------------------------------------------------------------
# Deterministic parameter init (PyTorch-Linear-style uniform ranges).
# W_o is split once here into its atom / aggregated-message halves.
# --------------------------------------------------------------------------
def init_params(key, init_message_dim, hidden_size):
    keys = jax.random.split(key, 6)

    def uniform(k, shape, fan_in):
        bound = 1.0 / math.sqrt(fan_in)
        return jax.random.uniform(k, shape, jnp.float32, -bound, bound)

    din, h = init_message_dim, hidden_size
    w_o = uniform(keys[4], (din + h, h), din + h)
    return {
        "W_i": uniform(keys[0], (din, h), din),
        "b_i": uniform(keys[1], (1, h), din),
        "W_h": uniform(keys[2], (h, h), h),
        "b_h": uniform(keys[3], (1, h), h),
        "W_o_atom": w_o[:din, :],
        "W_o_msg": w_o[din:, :],
        "b_o": uniform(keys[5], (1, h), din + h),
    }


if __name__ == "__main__":
    B = 16            # batch of molecules (packed G per grid step, >=2 steps)
    N_ATOMS = 16      # atoms per molecule (padded to sublane multiple internally)
    MAX_NEI = 4       # neighbor slots per atom (a2nei width)
    INIT_DIM = 32     # init_message_dim (atom feature dim)
    HIDDEN = 128      # hidden_size (multiple of 128 -> lane-dense MXU/stores)
    DEPTH = 3         # message passing depth

    key = jax.random.PRNGKey(0)
    k_feat, k_idx, k_par = jax.random.split(key, 3)

    init_messages = jax.random.normal(k_feat, (B, N_ATOMS, INIT_DIM), jnp.float32)
    a2nei = jax.random.randint(k_idx, (B, N_ATOMS, MAX_NEI), 0, N_ATOMS, jnp.int32)
    params = init_params(k_par, INIT_DIM, HIDDEN)

    out = mpn_encoder_forward(init_messages, a2nei, params, DEPTH)
    out = jax.block_until_ready(out)

    ref = mpn_encoder_reference(init_messages, a2nei, params, DEPTH)
    assert out.shape == (B, N_ATOMS, HIDDEN)
    assert jnp.allclose(out, ref, atol=1e-2, rtol=1e-2), \
        "Pallas kernel mismatch vs reference"

    print("KERNEL_OK")
</pallas_src>

<mosaic_0001>
module attributes {stable_mosaic.version = 11 : i64} {
  func.func @mpn_encoder_kernel(%arg0: i32, %arg1: memref<1x128x32xbf16, #tpu.memory_space<vmem>>, %arg2: memref<1x128x128xbf16, #tpu.memory_space<vmem>>, %arg3: memref<32x256xbf16, #tpu.memory_space<vmem>>, %arg4: memref<1x128xf32, #tpu.memory_space<vmem>>, %arg5: memref<128x128xbf16, #tpu.memory_space<vmem>>, %arg6: memref<1x128xf32, #tpu.memory_space<vmem>>, %arg7: memref<128x128xbf16, #tpu.memory_space<vmem>>, %arg8: memref<1x128xf32, #tpu.memory_space<vmem>>, %arg9: memref<1x128x128xf32, #tpu.memory_space<vmem>>) attributes {dimension_semantics = [#tpu.dimension_semantics<parallel>], iteration_bounds = array<i64: 2>, scalar_prefetch = 0 : i64, scratch_operands = 0 : i64, tpu.core_type = #tpu.core_type<tc>, window_params = [{transform_indices = @transform_0, window_bounds = array<i64: 1, 128, 32>}, {transform_indices = @transform_1, window_bounds = array<i64: 1, 128, 128>}, {pipeline_mode = #tpu.pipeline_mode<synchronous>, transform_indices = @transform_2, window_bounds = array<i64: 32, 256>}, {pipeline_mode = #tpu.pipeline_mode<synchronous>, transform_indices = @transform_3, window_bounds = array<i64: 1, 128>}, {pipeline_mode = #tpu.pipeline_mode<synchronous>, transform_indices = @transform_4, window_bounds = array<i64: 128, 128>}, {pipeline_mode = #tpu.pipeline_mode<synchronous>, transform_indices = @transform_5, window_bounds = array<i64: 1, 128>}, {pipeline_mode = #tpu.pipeline_mode<synchronous>, transform_indices = @transform_6, window_bounds = array<i64: 128, 128>}, {pipeline_mode = #tpu.pipeline_mode<synchronous>, transform_indices = @transform_7, window_bounds = array<i64: 1, 128>}, {transform_indices = @transform_8, window_bounds = array<i64: 1, 128, 128>}]} {
    %c0 = arith.constant 0 : index
    %c0_0 = arith.constant 0 : index
    %c0_1 = arith.constant 0 : index
    %0 = vector.load %arg1[%c0, %c0_0, %c0_1] : memref<1x128x32xbf16, #tpu.memory_space<vmem>>, vector<1x128x32xbf16>
    %1 = vector.shape_cast %0 : vector<1x128x32xbf16> to vector<128x32xbf16>
    %c0_2 = arith.constant 0 : index
    %c0_3 = arith.constant 0 : index
    %c0_4 = arith.constant 0 : index
    %2 = vector.load %arg2[%c0_2, %c0_3, %c0_4] : memref<1x128x128xbf16, #tpu.memory_space<vmem>>, vector<1x128x128xbf16>
    %3 = vector.shape_cast %2 : vector<1x128x128xbf16> to vector<128x128xbf16>
    %c0_5 = arith.constant 0 : index
    %c0_6 = arith.constant 0 : index
    %4 = vector.load %arg5[%c0_5, %c0_6] : memref<128x128xbf16, #tpu.memory_space<vmem>>, vector<128x128xbf16>
    %c0_7 = arith.constant 0 : index
    %c0_8 = arith.constant 0 : index
    %5 = vector.load %arg7[%c0_7, %c0_8] : memref<128x128xbf16, #tpu.memory_space<vmem>>, vector<128x128xbf16>
    %c0_9 = arith.constant 0 : index
    %c0_10 = arith.constant 0 : index
    %6 = vector.load %arg3[%c0_9, %c0_10] : memref<32x256xbf16, #tpu.memory_space<vmem>>, vector<32x256xbf16>
    %cst = arith.constant dense<0.000000e+00> : vector<128x256xf32>
    %7 = tpu.matmul %1, %6, %cst {dimension_numbers = #tpu.dot_dimension_numbers<[1], [0], [0], [1], [0, 0, 1, 1], [], []>} : vector<128x32xbf16>, vector<32x256xbf16>, vector<128x256xf32> -> vector<128x256xf32>
    %8 = vector.extract_strided_slice %7 {offsets = [0, 0], sizes = [128, 128], strides = [1, 1]} : vector<128x256xf32> to vector<128x128xf32>
    %c0_11 = arith.constant 0 : index
    %c0_12 = arith.constant 0 : index
    %9 = vector.load %arg4[%c0_11, %c0_12] : memref<1x128xf32, #tpu.memory_space<vmem>>, vector<1x128xf32>
    %10 = vector.broadcast %9 : vector<1x128xf32> to vector<128x128xf32>
    %11 = arith.addf %8, %10 : vector<128x128xf32>
    %12 = vector.extract_strided_slice %7 {offsets = [0, 128], sizes = [128, 128], strides = [1, 1]} : vector<128x256xf32> to vector<128x128xf32>
    %c0_13 = arith.constant 0 : index
    %c0_14 = arith.constant 0 : index
    %13 = vector.load %arg6[%c0_13, %c0_14] : memref<1x128xf32, #tpu.memory_space<vmem>>, vector<1x128xf32>
    %14 = vector.broadcast %13 : vector<1x128xf32> to vector<128x128xf32>
    %15 = arith.addf %11, %14 : vector<128x128xf32>
    %cst_15 = arith.constant 0.000000e+00 : f32
    %16 = vector.broadcast %cst_15 : f32 to vector<128x128xf32>
    %17 = arith.maximumf %11, %16 : vector<128x128xf32>
    %18 = arith.truncf %17 : vector<128x128xf32> to vector<128x128xbf16>
    %c0_i32 = arith.constant 0 : i32
    %cst_16 = arith.constant dense<0.000000e+00> : vector<128x128xf32>
    %19 = tpu.matmul %3, %18, %cst_16 {dimension_numbers = #tpu.dot_dimension_numbers<[1], [0], [0], [1], [0, 0, 1, 1], [], []>} : vector<128x128xbf16>, vector<128x128xbf16>, vector<128x128xf32> -> vector<128x128xf32>
    %20 = arith.truncf %19 : vector<128x128xf32> to vector<128x128xbf16>
    %cst_17 = arith.constant dense<0.000000e+00> : vector<128x128xf32>
    %21 = tpu.matmul %20, %4, %cst_17 {dimension_numbers = #tpu.dot_dimension_numbers<[1], [0], [0], [1], [0, 0, 1, 1], [], []>} : vector<128x128xbf16>, vector<128x128xbf16>, vector<128x128xf32> -> vector<128x128xf32>
    %22 = arith.addf %15, %21 : vector<128x128xf32>
    %cst_18 = arith.constant 0.000000e+00 : f32
    %23 = vector.broadcast %cst_18 : f32 to vector<128x128xf32>
    %24 = arith.maximumf %22, %23 : vector<128x128xf32>
    %25 = arith.truncf %24 : vector<128x128xf32> to vector<128x128xbf16>
    %c1_i32 = arith.constant 1 : i32
    %cst_19 = arith.constant dense<0.000000e+00> : vector<128x128xf32>
    %26 = tpu.matmul %3, %25, %cst_19 {dimension_numbers = #tpu.dot_dimension_numbers<[1], [0], [0], [1], [0, 0, 1, 1], [], []>} : vector<128x128xbf16>, vector<128x128xbf16>, vector<128x128xf32> -> vector<128x128xf32>
    %27 = arith.truncf %26 : vector<128x128xf32> to vector<128x128xbf16>
    %cst_20 = arith.constant dense<0.000000e+00> : vector<128x128xf32>
    %28 = tpu.matmul %27, %4, %cst_20 {dimension_numbers = #tpu.dot_dimension_numbers<[1], [0], [0], [1], [0, 0, 1, 1], [], []>} : vector<128x128xbf16>, vector<128x128xbf16>, vector<128x128xf32> -> vector<128x128xf32>
    %29 = arith.addf %15, %28 : vector<128x128xf32>
    %cst_21 = arith.constant 0.000000e+00 : f32
    %30 = vector.broadcast %cst_21 : f32 to vector<128x128xf32>
    %31 = arith.maximumf %29, %30 : vector<128x128xf32>
    %32 = arith.truncf %31 : vector<128x128xf32> to vector<128x128xbf16>
    %cst_22 = arith.constant dense<0.000000e+00> : vector<128x128xf32>
    %33 = tpu.matmul %3, %32, %cst_22 {dimension_numbers = #tpu.dot_dimension_numbers<[1], [0], [0], [1], [0, 0, 1, 1], [], []>} : vector<128x128xbf16>, vector<128x128xbf16>, vector<128x128xf32> -> vector<128x128xf32>
    %34 = arith.truncf %33 : vector<128x128xf32> to vector<128x128xbf16>
    %cst_23 = arith.constant dense<0.000000e+00> : vector<128x128xf32>
    %35 = tpu.matmul %34, %5, %cst_23 {dimension_numbers = #tpu.dot_dimension_numbers<[1], [0], [0], [1], [0, 0, 1, 1], [], []>} : vector<128x128xbf16>, vector<128x128xbf16>, vector<128x128xf32> -> vector<128x128xf32>
    %36 = arith.addf %12, %35 : vector<128x128xf32>
    %c0_24 = arith.constant 0 : index
    %c0_25 = arith.constant 0 : index
    %37 = vector.load %arg8[%c0_24, %c0_25] : memref<1x128xf32, #tpu.memory_space<vmem>>, vector<1x128xf32>
    %38 = vector.broadcast %37 : vector<1x128xf32> to vector<128x128xf32>
    %39 = arith.addf %36, %38 : vector<128x128xf32>
    %cst_26 = arith.constant 0.000000e+00 : f32
    %40 = vector.broadcast %cst_26 : f32 to vector<128x128xf32>
    %41 = arith.maximumf %39, %40 : vector<128x128xf32>
    %c0_27 = arith.constant 0 : index
    %c0_28 = arith.constant 0 : index
    %c0_29 = arith.constant 0 : index
    %42 = vector.load %arg9[%c0_27, %c0_28, %c0_29] : memref<1x128x128xf32, #tpu.memory_space<vmem>>, vector<1x128x128xf32>
    %43 = vector.shape_cast %42 : vector<1x128x128xf32> to vector<128x128xf32>
    %44 = vector.shape_cast %41 : vector<128x128xf32> to vector<1x128x128xf32>
    tpu.vector_store %arg9[%c0_27, %c0_28, %c0_29], %44 {strides = array<i32>} : memref<1x128x128xf32, #tpu.memory_space<vmem>>, vector<1x128x128xf32>,
    return
  }
  func.func @transform_0(%arg0: i32) -> (i32, i32, i32) {
    %c0_i32 = arith.constant 0 : i32
    %c0_i32_0 = arith.constant 0 : i32
    %c0_i32_1 = arith.constant 0 : i32
    return %arg0, %c0_i32, %c0_i32_0 : i32, i32, i32
  }
  func.func @transform_1(%arg0: i32) -> (i32, i32, i32) {
    %c0_i32 = arith.constant 0 : i32
    %c0_i32_0 = arith.constant 0 : i32
    %c0_i32_1 = arith.constant 0 : i32
    return %arg0, %c0_i32, %c0_i32_0 : i32, i32, i32
  }
  func.func @transform_2(%arg0: i32) -> (i32, i32) {
    %c0_i32 = arith.constant 0 : i32
    %c0_i32_0 = arith.constant 0 : i32
    %c0_i32_1 = arith.constant 0 : i32
    return %c0_i32, %c0_i32_0 : i32, i32
  }
  func.func @transform_3(%arg0: i32) -> (i32, i32) {
    %c0_i32 = arith.constant 0 : i32
    %c0_i32_0 = arith.constant 0 : i32
    %c0_i32_1 = arith.constant 0 : i32
    return %c0_i32, %c0_i32_0 : i32, i32
  }
  func.func @transform_4(%arg0: i32) -> (i32, i32) {
    %c0_i32 = arith.constant 0 : i32
    %c0_i32_0 = arith.constant 0 : i32
    %c0_i32_1 = arith.constant 0 : i32
    return %c0_i32, %c0_i32_0 : i32, i32
  }
  func.func @transform_5(%arg0: i32) -> (i32, i32) {
    %c0_i32 = arith.constant 0 : i32
    %c0_i32_0 = arith.constant 0 : i32
    %c0_i32_1 = arith.constant 0 : i32
    return %c0_i32, %c0_i32_0 : i32, i32
  }
  func.func @transform_6(%arg0: i32) -> (i32, i32) {
    %c0_i32 = arith.constant 0 : i32
    %c0_i32_0 = arith.constant 0 : i32
    %c0_i32_1 = arith.constant 0 : i32
    return %c0_i32, %c0_i32_0 : i32, i32
  }
  func.func @transform_7(%arg0: i32) -> (i32, i32) {
    %c0_i32 = arith.constant 0 : i32
    %c0_i32_0 = arith.constant 0 : i32
    %c0_i32_1 = arith.constant 0 : i32
    return %c0_i32, %c0_i32_0 : i32, i32
  }
  func.func @transform_8(%arg0: i32) -> (i32, i32, i32) {
    %c0_i32 = arith.constant 0 : i32
    %c0_i32_0 = arith.constant 0 : i32
    %c0_i32_1 = arith.constant 0 : i32
    return %arg0, %c0_i32, %c0_i32_0 : i32, i32, i32
  }
}

</mosaic_0001>

<bundles_post_ra>
// kernel: tpu_custom_call.1
= control target key start
LH: loop header
LB: loop body
LE: loop exit
PB: predicated region body
PF: predicated region fallthrough
CT: control target
= control target key end

     0   :  { %13 = vsyncpa [#allocation3], 0  ;;  %s2917_s0 = inlined_call_operand.vmem [shape: bf16[2,128,32], index: 0, kind: input, shape index: {}]   ;;  %s2918_s1 = inlined_call_operand.vmem [shape: bf16[2,128,128], index: 1, kind: input, shape index: {}]   ;;  %s2919_s2 = inlined_call_operand.vmem [shape: bf16[32,256], index: 2, kind: input, shape index: {}]   ;;  %s2920_s3 = inlined_call_operand.vmem [shape: f32[1,128], index: 3, kind: input, shape index: {}]   ;;  %s2921_s4 = inlined_call_operand.hbm [shape: bf16[128,128], index: 4, kind: input, shape index: {}]   ;;  %s2922_s5 = inlined_call_operand.vmem [shape: f32[1,128], index: 5, kind: input, shape index: {}]   ;;  %s2923_s6 = inlined_call_operand.hbm [shape: bf16[128,128], index: 6, kind: input, shape index: {}]   ;;  %s2924_s7 = inlined_call_operand.vmem [shape: f32[1,128], index: 7, kind: input, shape index: {}]   ;;  %s2925_s8 = inlined_call_operand.hbm [shape: f32[2,128,128], index: 8, kind: output, shape index: {}]  }
   0x1   :  { %14 = vsyncpa [#allocation6], 0 }
   0x2   :  { %15 = vsyncpa [#allocation4], 0 }
   0x3   :  { %17 = vsyncpa [#allocation4 + $0x1], 0  ;;  %s2358_s27 = smov 0   ;;  %s2360_s28 = smov 0  }
   0x4   :  { %s2362_s29 = smov 0   ;;  %s2364_s30 = smov 0  }
   0x5 LB: > { %2930 = sst [smem:[#allocation11_spill]] %s2299_s29  ;;  %s2379_s9 = sadd.s32 4294967295, %s2303_s30   ;;  %s2303_s30 = sphi %s2364_s30, %s2947_s30   ;;  %s2299_s29 = sphi %s2362_s29, %s2944_s29   ;;  %s2295_s28 = sphi %s2360_s28, %s2946_s28   ;;  %s2291_s27 = sphi %s2358_s27, %s2945_s27  }
   0x6   : > { %s1702_s10 = sadd.s32 4294967294, %s2303_s30   ;;  %s2383_s11 = sadd.s32 1, %s2303_s30  }
   0x7   : > { %s208_s12 = sadd.s32 1, %s2299_s29  ;;  %s205_s13 = ssub.s32 %s2303_s30, %s2383_s11 }
   0x8   : > { %p218_p0 = scmp.ne.s32.totalorder %s2299_s29, %s2295_s28  ;;  %p206_p1 = scmp.eq.s32.totalorder %s205_s13, 0 }
   0x9   : > { %p219_p2 = scmp.eq.s32.totalorder %s2379_s9, 1  ;;  %p224_p3 = scmp.ne.s32.totalorder %s2295_s28, %s2291_s27 }
   0xa   : > { %p225_p4 = scmp.eq.s32.totalorder %s1702_s10, 1  ;;  %p1703_p7 = scmp.ge.s32.totalorder %s2303_s30, 1 }
   0xb   : > { %s2394_s14 = scalar_select %p206_p1, %s2299_s29, %s208_s12  }
   0xc   : > { %p2396_p5 = por %p219_p2, %p218_p0  ;;  %p2400_p6 = por %p225_p4, %p224_p3 }
   0xd   : > { %2931 = sst [smem:[#allocation12_spill]] %s2394_s14  ;;  %p232_p8 = scmp.lt.s32.totalorder %s2303_s30, 3 }
   0xe   : > { %s2932_s15 = scalar_select %p2396_p5, 1, 0 }
   0xf   : > { %s2933_s16 = scalar_select %p2400_p6, 1, 0 }
  0x10   : > { %p2926_p9 = scmp.eq.s32.totalorder %s2379_s9, 0  ;;  %p2407_p10 = pnand %p1703_p7, %p232_p8 }
  0x11   : > { %s2305_s18 = smov [#allocation2]   ;;  %s2306_s21 = smov [#allocation5]  }
  0x12   : > { %s2934_s17 = scalar_select %p2407_p10, 1, 0 }
  0x13   : > { %s250_s19 = sshll.u32 %s2305_s18, 4  ;;  %p2084_p11 = pneg %p2407_p10  ;;  %s251_s19 = int_to_ptr.vmem [resolvable:$true] %s250_s19 }
  0x14   : > { %s266_s22 = sshll.u32 %s2306_s21, 4  ;;  %s2177_s25 = scalar_lea.hbm %s2921_s4, 1024  ;;  %s2419_s22 = int_to_ptr.vmem [resolvable:$true] %s266_s22 }
  0x15   : > { %p2415_p12 = pnand %p2926_p9, %p2084_p11  ;;  %p2178_p13 = scmp.ne.s32.totalorder %s2921_s4, %s2177_s25 }
  0x16   : > { %p2184_p3 = scmp.lt.u32.totalorder %s2177_s25, %s2921_s4 }
  0x17   : > { %p2179_p0 = pneg %p2415_p12 }
  0x19   : > { %p2180_p1 = pnand %p2179_p0, %p2178_p13 }
  0x1b   : > { %p2181_p2 = pneg %p2180_p1 }
  0x1d   : > { %p2186_p4 = pnand %p2184_p3, %p2181_p2 }
  0x1f   : > { %2189 = shalt.err (!%p2186_p4)
}
  0x20   : > { %s2190_s18 = scalar_lea.vmem %s251_s19, 1024  ;;  %p2198_p9 = scmp.lt.s32.totalorder %s251_s19, %s251_s19 }
  0x21   : > { %p2191_p7 = scmp.ne.s32.totalorder %s251_s19, %s2190_s18  ;;  %p2199_p6 = scmp.lt.s32.totalorder %s2190_s18, %s2190_s18 }
  0x23   : > { %p2193_p8 = pnand %p2191_p7, %p2179_p0  ;;  %p2200_p5 = por %p2199_p6, %p2198_p9 }
  0x25   : > { %p2194_p11 = pneg %p2193_p8 }
  0x27   : > { %p2201_p10 = pnand %p2200_p5, %p2194_p11 }
  0x29   : > { %2204 = shalt.err (!%p2201_p10)
}
  0x2a   : > { %s2307_s21 = smov 64   ;;  %s2308_s23 = smov 4  }
  0x2b   : > { %2087 = dma.hbm_to_vmem [thread:$0]  (!%p2415_p12), %s2921_s4, 1024, %s251_s19, [#allocation3], %s2307_s21, %s2307_s21, %s2308_s23  }
  0x2c   : > { %s2205_s12 = scalar_lea.hbm %s2923_s6, 1024 }
  0x2d   : > { %p2206_p13 = scmp.ne.s32.totalorder %s2923_s6, %s2205_s12  ;;  %p2212_p9 = scmp.lt.u32.totalorder %s2205_s12, %s2923_s6 }
  0x2f   : > { %p2208_p5 = pnand %p2206_p13, %p2179_p0 }
  0x31   : > { %p2209_p6 = pneg %p2208_p5 }
  0x33   : > { %p2214_p10 = pnand %p2212_p9, %p2209_p6 }
  0x35   : > { %2217 = shalt.err (!%p2214_p10)
}
  0x36   : > { %s2218_s19 = scalar_lea.vmem %s2419_s22, 1024  ;;  %p2226_p4 = scmp.lt.s32.totalorder %s2419_s22, %s2419_s22 }
  0x37   : > { %p2219_p1 = scmp.ne.s32.totalorder %s2419_s22, %s2218_s19  ;;  %p2227_p7 = scmp.lt.s32.totalorder %s2218_s19, %s2218_s19 }
  0x39   : > { %p2221_p2 = pnand %p2219_p1, %p2179_p0  ;;  %p2228_p8 = por %p2227_p7, %p2226_p4 }
  0x3b   : > { %p2222_p3 = pneg %p2221_p2 }
  0x3d   : > { %p2229_p11 = pnand %p2228_p8, %p2222_p3 }
  0x3f   : > { %2232 = shalt.err (!%p2229_p11)
}
  0x40   : > { %2090 = dma.hbm_to_vmem [thread:$0]  (!%p2415_p12), %s2923_s6, 1024, %s2419_s22, [#allocation6], %s2307_s21, %s2307_s21, %s2308_s23  }
  0x41   : > { %p2936_p13 = scmp.ne.s32.totalorder %s2934_s17, 0 }
  0x42   : > { %p2937_p5 = scmp.eq.s32.totalorder (!%p2936_p13), %s2379_s9, 0 }
  0x43   : > { %301 = sbr.rel (%p2936_p13) target bundleno = 1788 (0x6fc), region = 52 }
  0x4a   : > { %2278 = dma.done.wait (%p2937_p5), [#allocation3], 1024   ;;  %p2938_p0 = pmov %p2937_p5 }
  0x4c   : > { %2280 = vsyncadd (%p2938_p0), [#allocation3], 4294966272  ;;  %p2939_p6 = pmov %p2938_p0 }
  0x4d   : > { %p2940_p9 = pmov %p2938_p0 }
  0x4e   : > { %2282 = dma.done.wait (%p2939_p6), [#allocation6], 1024  }
  0x4f   : > { %2284 = vsyncadd (%p2940_p9), [#allocation6], 4294966272  ;;  %p344_p10 = scmp.lt.s32.totalorder %s2379_s9, 1  ;;  %v2309_v0 = vmov 0   ;;  %v2139_v1 = vld [vmem:[%s2919_s2 + $0x4] ss:$8 sps:$4 sm:$0xff]  }
  0x50   : > { %540 = vmatprep.mubr.bf16.mxu0 %v2309_v0  ;;  %v2141_v2 = vld [vmem:[%s2919_s2] ss:$8 sps:$4 sm:$0xff]   ;;  %508 = vmatprep.subr.bf16.mxu0 %v2139_v1  ;;  %v2142_v3 = vld [vmem:[%s2919_s2 + $0x14] ss:$8 sps:$4 sm:$0xff]   ;;  %v2144_v4 = vld [vmem:[%s2919_s2 + $0x10] ss:$8 sps:$4 sm:$0xff]  }
  0x51   : > { %s2480_s20 = scalar_select %p344_p10, %s2379_s9, 1  ;;  %509 = vmatpush1.bf16.msra.mxu0 %v2141_v2  ;;  %vm483_vm0 = vcmask 261120   ;;  %v2523_v14 = vld [vmem:[%s2920_s3] ss:$0 sm:$0xff] }
  0x52   : > { %510 = vmatprep.subr.bf16.mxu0 %v2142_v3  ;;  %s341_s24 = sand.u32 1, %s2295_s28   ;;  %s1769_s13 = sshll.u32 %s2379_s9, 11 }
  0x53   : > { %s1767_s17 = sshll.u32 %s2480_s20, 6  ;;  %s2867_s14 = scalar_lea.hbm %s2925_s8, %s1769_s13 }
  0x54   : > { %s348_s10 = scalar_lea.vmem %s2917_s0, %s1767_s17  ;;  %s2513_s22 = scalar_lea.vmem %s2918_s1, %s1767_s17 }
  0x55   : > { %v2145_v5 = vld [vmem:[%s348_s10] sm:$0xff]   ;;  %511 = vmatpush1.bf16.msra.mxu0 %v2144_v4  ;;  %v2146_v6 = vld [vmem:[%s348_s10 + $0x8] sm:$0xff]   ;;  %v2147_v7 = vld [vmem:[%s348_s10 + $0x10] sm:$0xff]   ;;  %s2876_s9 = scalar_lea.sflag [#allocation4], %s341_s24  ;;  %p2941_p1 = scmp.ne.s32.totalorder %s2932_s15, 0 }
  0x56   : > { %v2148_v8 = vld [vmem:[%s348_s10 + $0x18] sm:$0xff]   ;;  %v2149_v9 = vld [vmem:[%s348_s10 + $0x20] sm:$0xff]   ;;  %v2150_v10 = vld [vmem:[%s348_s10 + $0x28] sm:$0xff]   ;;  %s2310_s21 = smov [#allocation7]  }
  0x57   : > { %v2151_v11 = vld [vmem:[%s348_s10 + $0x30] sm:$0xff]   ;;  %v2152_v12 = vld [vmem:[%s348_s10 + $0x38] sm:$0xff]   ;;  %v2516_v13 = vld [vmem:[%s2513_s22] sm:$0xff]   ;;  %s1710_s10 = sshll.u32 %s341_s24, 7  ;;  %s2237_s23 = sshll.u32 %s2310_s21, 4  ;;  %s2238_s23 = int_to_ptr.vmem [resolvable:$false] %s2237_s23 }
  0x58   : > { %1727 = vmatmul.mubr.msk.bf16.vlgmr.msra.gmra.mrb[0].mxu0 %vm483_vm0, %v2145_v5  ;;  %1882 = vmatprep.mubr.bf16.mxu1 %v2516_v13  ;;  %s2823_s12 = scalar_lea.vmem [#allocation7], %s1710_s10  ;;  %s2239_s20 = scalar_lea.vmem %s2238_s23, 4096 }
  0x59   : > { %550 = vmatprep.mubr.bf16.mxu0 %v2309_v0  ;;  %s1606_s18 = sshll.u32 %s2823_s12, 4  ;;  %s2869_s18 = int_to_ptr.vmem [resolvable:$true] %s1606_s18 }
  0x5a   : > { %p2240_p4 = scmp.lt.s32.totalorder %s2869_s18, %s2238_s23 }
  0x60   : > { %1728 = vmatmul.mubr.msk.bf16.gmra.mrb[4].mxu0 %vm483_vm0, %v2146_v6 }
  0x61   : > { %560 = vmatprep.mubr.bf16.mxu0 %v2309_v0 }
  0x68   : > { %1729 = vmatmul.mubr.msk.bf16.gmra.mrb[8].mxu0 %vm483_vm0, %v2147_v7 }
  0x69   : > { %570 = vmatprep.mubr.bf16.mxu0 %v2309_v0 }
  0x70   : > { %1730 = vmatmul.mubr.msk.bf16.gmra.mrb[12].mxu0 %vm483_vm0, %v2148_v8 }
  0x71   : > { %580 = vmatprep.mubr.bf16.mxu0 %v2309_v0 }
  0x78   : > { %1731 = vmatmul.mubr.msk.bf16.gmra.mrb[16].mxu0 %vm483_vm0, %v2149_v9 }
  0x79   : > { %590 = vmatprep.mubr.bf16.mxu0 %v2309_v0 }
  0x80   : > { %1732 = vmatmul.mubr.msk.bf16.gmra.mrb[20].mxu0 %vm483_vm0, %v2150_v10 }
  0x81   : > { %600 = vmatprep.mubr.bf16.mxu0 %v2309_v0 }
  0x88   : > { %1733 = vmatmul.mubr.msk.bf16.gmra.mrb[24].mxu0 %vm483_vm0, %v2151_v11 }
  0x89   : > { %610 = vmatprep.mubr.bf16.mxu0 %v2309_v0 }
  0x90   : > { %1734 = vmatmul.mubr.msk.bf16.gmra.mrb[28].mxu0 %vm483_vm0, %v2152_v12 }
  0x91   : > { %1946 = vmatprep.mubr.bf16.mxu0 %v2516_v13 }
 0x12b   : > { %v542_v15 = vpop.f32.mrb[0].mxu0 }
 0x12c   : > { %v2526_v16 = vadd.f32 %v2523_v14, %v542_v15  ;;  %v2528_v17 = vpop.f32.mrb[1].mxu0 }
 0x12d   : > { %v546_v18 = vpop.f32.mrb[2].mxu0 }
 0x12e   : > { %v2531_v19 = vadd.f32 %v2523_v14, %v546_v18  ;;  %v2533_v20 = vpop.f32.mrb[3].mxu0  ;;  %v667_v21 = vmax.f32 %v2526_v16, 0.0 }
 0x130   : > { %v668_v22 = vmax.f32 %v2531_v19, 0.0 }
 0x132   : > { %v683_v23 = vpack.c.bf16 %v668_v22, %v667_v21 }
 0x133   : > { %v552_v24 = vpop.f32.mrb[4].mxu0 }
 0x134   : > { %v2538_v25 = vadd.f32 %v2523_v14, %v552_v24  ;;  %v2540_v26 = vpop.f32.mrb[5].mxu0  ;;  %1866 = vmatprep.subr.bf16.mxu1 %v683_v23 }
 0x135   : > { %v556_v27 = vpop.f32.mrb[6].mxu0  ;;  %1867 = vmatpush3.bf16.msra.mxu1 %v683_v23 }
 0x136   : > { %v2543_v28 = vadd.f32 %v2523_v14, %v556_v27  ;;  %v2545_v29 = vpop.f32.mrb[7].mxu0  ;;  %v669_v30 = vmax.f32 %v2538_v25, 0.0 }
 0x138   : > { %v670_v31 = vmax.f32 %v2543_v28, 0.0 }
 0x13a   : > { %v684_v32 = vpack.c.bf16 %v670_v31, %v669_v30 }
 0x13b   : > { %v562_v33 = vpop.f32.mrb[8].mxu0 }
 0x13c   : > { %v2550_v34 = vadd.f32 %v2523_v14, %v562_v33  ;;  %v2552_v35 = vpop.f32.mrb[9].mxu0  ;;  %1868 = vmatprep.subr.bf16.mxu1 %v684_v32  ;;  %v2161_v33 = vld [vmem:[#allocation2] sm:$0xff]  }
 0x13d   : > { %v566_v36 = vpop.f32.mrb[10].mxu0  ;;  %1869 = vmatpush3.bf16.msra.mxu1 %v684_v32 }
 0x13e   : > { %v2555_v37 = vadd.f32 %v2523_v14, %v566_v36  ;;  %v2557_v38 = vpop.f32.mrb[11].mxu0  ;;  %v671_v39 = vmax.f32 %v2550_v34, 0.0  ;;  %v2622_v36 = vld [vmem:[%s2513_s22 + $0x8] sm:$0xff]  }
 0x140   : > { %v672_v40 = vmax.f32 %v2555_v37, 0.0 }
 0x142   : > { %v685_v41 = vpack.c.bf16 %v672_v40, %v671_v39  ;;  %v2625_v39 = vld [vmem:[%s2513_s22 + $0x10] sm:$0xff]   ;;  %v2162_v40 = vld [vmem:[#allocation2 + $0x8] sm:$0xff]  }
 0x143   : > { %v572_v42 = vpop.f32.mrb[12].mxu0 }
 0x144   : > { %v2562_v43 = vadd.f32 %v2523_v14, %v572_v42  ;;  %v2564_v44 = vpop.f32.mrb[13].mxu0  ;;  %1870 = vmatprep.subr.bf16.mxu1 %v685_v41  ;;  %v2633_v42 = vld [vmem:[%s2513_s22 + $0x20] sm:$0xff]  }
 0x145   : > { %v576_v45 = vpop.f32.mrb[14].mxu0  ;;  %1871 = vmatpush3.bf16.msra.mxu1 %v685_v41  ;;  %v2630_v41 = vld [vmem:[%s2513_s22 + $0x18] sm:$0xff]  }
 0x146   : > { %v2567_v46 = vadd.f32 %v2523_v14, %v576_v45  ;;  %v2569_v47 = vpop.f32.mrb[15].mxu0  ;;  %v673_v48 = vmax.f32 %v2562_v43, 0.0  ;;  %v2164_v45 = vld [vmem:[#allocation2 + $0x18] sm:$0xff]  }
 0x148   : > { %v674_v49 = vmax.f32 %v2567_v46, 0.0 }
 0x14a   : > { %v686_v50 = vpack.c.bf16 %v674_v49, %v673_v48  ;;  %v2165_v48 = vld [vmem:[#allocation2 + $0x20] sm:$0xff]   ;;  %v2638_v49 = vld [vmem:[%s2513_s22 + $0x28] sm:$0xff]  }
 0x14b   : > { %v582_v51 = vpop.f32.mrb[16].mxu0 }
 0x14c   : > { %v2574_v52 = vadd.f32 %v2523_v14, %v582_v51  ;;  %v2576_v53 = vpop.f32.mrb[17].mxu0  ;;  %1872 = vmatprep.subr.bf16.mxu1 %v686_v50  ;;  %v2166_v51 = vld [vmem:[#allocation2 + $0x28] sm:$0xff]  }
 0x14d   : > { %v586_v54 = vpop.f32.mrb[18].mxu0  ;;  %1873 = vmatpush3.bf16.msra.mxu1 %v686_v50  ;;  %v2641_v50 = vld [vmem:[%s2513_s22 + $0x30] sm:$0xff]  }
 0x14e   : > { %v2579_v55 = vadd.f32 %v2523_v14, %v586_v54  ;;  %v2581_v56 = vpop.f32.mrb[19].mxu0  ;;  %v675_v57 = vmax.f32 %v2574_v52, 0.0  ;;  %v2167_v54 = vld [vmem:[#allocation2 + $0x30] sm:$0xff]  }
 0x150   : > { %v676_v58 = vmax.f32 %v2579_v55, 0.0 }
 0x152   : > { %v687_v59 = vpack.c.bf16 %v676_v58, %v675_v57  ;;  %v2646_v57 = vld [vmem:[%s2513_s22 + $0x38] sm:$0xff]   ;;  %s2233_s22 = scalar_lea.vmem %s2869_s18, 2048 }
 0x153   : > { %v592_v60 = vpop.f32.mrb[20].mxu0  ;;  %v2168_v58 = vld [vmem:[#allocation2 + $0x38] sm:$0xff]   ;;  %p2234_p12 = scmp.ne.s32.totalorder %s2869_s18, %s2233_s22  ;;  %p2241_p7 = scmp.lt.s32.totalorder %s2239_s20, %s2233_s22 }
 0x154   : > { %v2586_v61 = vadd.f32 %v2523_v14, %v592_v60  ;;  %v2588_v62 = vpop.f32.mrb[21].mxu0  ;;  %1874 = vmatprep.subr.bf16.mxu1 %v687_v59 }
 0x155   : > { %v596_v63 = vpop.f32.mrb[22].mxu0  ;;  %1875 = vmatpush3.bf16.msra.mxu1 %v687_v59  ;;  %p2235_p2 = pnand %p2234_p12, %p2941_p1  ;;  %p2242_p8 = por %p2241_p7, %p2240_p4 }
 0x156   : > { %v2591_v0 = vadd.f32 %v2523_v14, %v596_v63  ;;  %v2593_v1 = vpop.f32.mrb[23].mxu0  ;;  %v677_v2 = vmax.f32 %v2586_v61, 0.0 }
 0x157   : > { %p2236_p3 = pneg %p2235_p2 }
 0x158   : > { %v678_v3 = vmax.f32 %v2591_v0, 0.0 }
 0x159   : > { %p2243_p11 = pnand %p2242_p8, %p2236_p3 }
 0x15a   : > { %v688_v4 = vpack.c.bf16 %v678_v3, %v677_v2 }
 0x15b   : > { %v602_v5 = vpop.f32.mrb[24].mxu0 }
 0x15c   : > { %v2598_v6 = vadd.f32 %v2523_v14, %v602_v5  ;;  %v2600_v7 = vpop.f32.mrb[25].mxu0  ;;  %1876 = vmatprep.subr.bf16.mxu1 %v688_v4 }
 0x15d   : > { %v606_v8 = vpop.f32.mrb[26].mxu0  ;;  %1877 = vmatpush3.bf16.msra.mxu1 %v688_v4 }
 0x15e   : > { %v2603_v9 = vadd.f32 %v2523_v14, %v606_v8  ;;  %v2605_v10 = vpop.f32.mrb[27].mxu0  ;;  %v679_v11 = vmax.f32 %v2598_v6, 0.0 }
 0x160   : > { %v680_v12 = vmax.f32 %v2603_v9, 0.0 }
 0x162   : > { %v689_v15 = vpack.c.bf16 %v680_v12, %v679_v11 }
 0x163   : > { %v612_v18 = vpop.f32.mrb[28].mxu0 }
 0x164   : > { %v2610_v21 = vadd.f32 %v2523_v14, %v612_v18  ;;  %v2612_v22 = vpop.f32.mrb[29].mxu0  ;;  %1878 = vmatprep.subr.bf16.mxu1 %v689_v15 }
 0x165   : > { %v616_v23 = vpop.f32.mrb[30].mxu0  ;;  %1879 = vmatpush3.bf16.msra.mxu1 %v689_v15 }
 0x166   : > { %v2615_v24 = vadd.f32 %v2523_v14, %v616_v23  ;;  %v2617_v27 = vpop.f32.mrb[31].mxu0  ;;  %v681_v30 = vmax.f32 %v2610_v21, 0.0  ;;  %v2163_v14 = vld [vmem:[#allocation2 + $0x10] sm:$0xff]  }
 0x168   : > { %v682_v31 = vmax.f32 %v2615_v24, 0.0 }
 0x16a   : > { %v690_v32 = vpack.c.bf16 %v682_v31, %v681_v30 }
 0x16c   : > { %1880 = vmatprep.subr.bf16.mxu1 %v690_v32 }
 0x16d   : > { %1881 = vmatpush3.bf16.msra.mxu1 %v690_v32 }
 0x16e   : > { %1898 = vmatprep.subr.bf16.mxu1 %v2161_v33 }
 0x170   : > { %1883 = vmatmul.mubr.bf16.vlgmr.msra.gmra.mrb[0].mxu1 %v2622_v36 }
 0x171   : > { %1886 = vmatprep.mubr.bf16.mxu1 %v2625_v39  ;;  %1899 = vmatpush3.bf16.msra.mxu1 %v2161_v33 }
 0x172   : > { %1900 = vmatprep.subr.bf16.mxu1 %v2162_v40 }
 0x175   : > { %1901 = vmatpush3.bf16.msra.mxu1 %v2162_v40 }
 0x176   : > { %1902 = vmatprep.subr.bf16.mxu1 %v2163_v14 }
 0x178   : > { %1887 = vmatmul.mubr.bf16.gmra.mrb[4].mxu1 %v2630_v41 }
 0x179   : > { %1890 = vmatprep.mubr.bf16.mxu1 %v2633_v42  ;;  %1903 = vmatpush3.bf16.msra.mxu1 %v2163_v14 }
 0x17a   : > { %1904 = vmatprep.subr.bf16.mxu1 %v2164_v45 }
 0x17d   : > { %1905 = vmatpush3.bf16.msra.mxu1 %v2164_v45 }
 0x17e   : > { %1906 = vmatprep.subr.bf16.mxu1 %v2165_v48 }
 0x180   : > { %1891 = vmatmul.mubr.bf16.gmra.mrb[8].mxu1 %v2638_v49 }
 0x181   : > { %1894 = vmatprep.mubr.bf16.mxu1 %v2641_v50  ;;  %1907 = vmatpush3.bf16.msra.mxu1 %v2165_v48 }
 0x182   : > { %1908 = vmatprep.subr.bf16.mxu1 %v2166_v51 }
 0x185   : > { %1909 = vmatpush3.bf16.msra.mxu1 %v2166_v51 }
 0x186   : > { %1910 = vmatprep.subr.bf16.mxu1 %v2167_v54 }
 0x188   : > { %1895 = vmatmul.mubr.bf16.gmra.mrb[12].mxu1 %v2646_v57 }
 0x189   : > { %1911 = vmatpush3.bf16.msra.mxu1 %v2167_v54 }
 0x18a   : > { %1912 = vmatprep.subr.bf16.mxu1 %v2168_v58 }
 0x18d   : > { %1913 = vmatpush3.bf16.msra.mxu1 %v2168_v58 }
 0x18e   : > { %1962 = vmatprep.subr.bf16.mxu1 %v2161_v33 }
 0x243   : > { %v1884_v59 = vpop.f32.mrb[0].mxu1 }
 0x244   : > { %v773_v60 = vpop.f32.mrb[1].mxu1 }
 0x245   : > { %v1885_v63 = vpop.f32.mrb[2].mxu1 }
 0x246   : > { %v837_v2 = vpack.c.bf16 %v1885_v63, %v1884_v59  ;;  %v776_v3 = vpop.f32.mrb[3].mxu1 }
 0x247   : > { %v836_v4 = vpack.c.bf16 %v776_v3, %v773_v60 }
 0x249   : > { %1914 = vmatprep.mubr.bf16.mxu1 %v836_v4 }
 0x24a   : > { %1915 = vmatmul.mubr.bf16.vlgmr.msra.gmra.mrb[16].mxu1 %v837_v2 }
 0x24b   : > { %v1888_v5 = vpop.f32.mrb[4].mxu1  ;;  %1963 = vmatpush3.bf16.msra.mxu1 %v2161_v33 }
 0x24c   : > { %v789_v8 = vpop.f32.mrb[5].mxu1  ;;  %1964 = vmatprep.subr.bf16.mxu1 %v2162_v40 }
 0x24d   : > { %v1889_v11 = vpop.f32.mrb[6].mxu1 }
 0x24e   : > { %v839_v12 = vpack.c.bf16 %v1889_v11, %v1888_v5  ;;  %v792_v15 = vpop.f32.mrb[7].mxu1 }
 0x24f   : > { %v838_v18 = vpack.c.bf16 %v792_v15, %v789_v8  ;;  %1965 = vmatpush3.bf16.msra.mxu1 %v2162_v40 }
 0x250   : > { %1966 = vmatprep.subr.bf16.mxu1 %v2163_v14 }
 0x251   : > { %1918 = vmatprep.mubr.bf16.mxu1 %v838_v18 }
 0x252   : > { %1919 = vmatmul.mubr.bf16.gmra.mrb[20].mxu1 %v839_v12 }
 0x253   : > { %v1892_v23 = vpop.f32.mrb[8].mxu1  ;;  %1967 = vmatpush3.bf16.msra.mxu1 %v2163_v14  ;;  %v2652_v14 = vld [vmem:[%s2922_s5] ss:$0 sm:$0xff] }
 0x254   : > { %v805_v30 = vpop.f32.mrb[9].mxu1  ;;  %1968 = vmatprep.subr.bf16.mxu1 %v2164_v45  ;;  %v2660_v5 = vadd.f32 %v2652_v14, %v2526_v16  ;;  %v2670_v12 = vadd.f32 %v2652_v14, %v2531_v19  ;;  %v2680_v19 = vadd.f32 %v2652_v14, %v2550_v34 }
 0x255   : > { %v1893_v31 = vpop.f32.mrb[10].mxu1 }
 0x256   : > { %v841_v32 = vpack.c.bf16 %v1893_v31, %v1892_v23  ;;  %v808_v59 = vpop.f32.mrb[11].mxu1 }
 0x257   : > { %v840_v60 = vpack.c.bf16 %v808_v59, %v805_v30  ;;  %1969 = vmatpush3.bf16.msra.mxu1 %v2164_v45  ;;  %v2656_v45 = vadd.f32 %v2652_v14, %v2538_v25 }
 0x258   : > { %1970 = vmatprep.subr.bf16.mxu1 %v2165_v48 }
 0x259   : > { %1922 = vmatprep.mubr.bf16.mxu1 %v840_v60 }
 0x25a   : > { %1923 = vmatmul.mubr.bf16.gmra.mrb[24].mxu1 %v841_v32 }
 0x25b   : > { %v1896_v33 = vpop.f32.mrb[12].mxu1  ;;  %1971 = vmatpush3.bf16.msra.mxu1 %v2165_v48 }
 0x25c   : > { %v821_v63 = vpop.f32.mrb[13].mxu1  ;;  %1972 = vmatprep.subr.bf16.mxu1 %v2166_v51 }
 0x25d   : > { %v1897_v40 = vpop.f32.mrb[14].mxu1 }
 0x25e   : > { %v843_v2 = vpack.c.bf16 %v1897_v40, %v1896_v33  ;;  %v824_v3 = vpop.f32.mrb[15].mxu1  ;;  %v2685_v40 = vadd.f32 %v2652_v14, %v2567_v46 }
 0x25f   : > { %v842_v4 = vpack.c.bf16 %v824_v3, %v821_v63  ;;  %1973 = vmatpush3.bf16.msra.mxu1 %v2166_v51 }
 0x260   : > { %1974 = vmatprep.subr.bf16.mxu1 %v2167_v54 }
 0x261   : > { %1926 = vmatprep.mubr.bf16.mxu1 %v842_v4 }
 0x262   : > { %1927 = vmatmul.mubr.bf16.gmra.mrb[28].mxu1 %v843_v2 }
 0x263   : > { %1975 = vmatpush3.bf16.msra.mxu1 %v2167_v54  ;;  %v2665_v54 = vadd.f32 %v2652_v14, %v2543_v28  ;;  %v2676_v28 = vadd.f32 %v2652_v14, %v2562_v43  ;;  %v2690_v43 = vadd.f32 %v2652_v14, %v2555_v37 }
 0x264   : > { %1976 = vmatprep.subr.bf16.mxu1 %v2168_v58 }
 0x267   : > { %1977 = vmatpush3.bf16.msra.mxu1 %v2168_v58 }
 0x31d   : > { %v1916_v48 = vpop.f32.mrb[16].mxu1 }
 0x31e   : > { %v991_v51 = vadd.f32 %v1916_v48, %v2656_v45  ;;  %v926_v8 = vpop.f32.mrb[17].mxu1 }
 0x31f   : > { %v989_v58 = vadd.f32 %v926_v8, %v2660_v5  ;;  %v1917_v11 = vpop.f32.mrb[18].mxu1 }
 0x320   : > { %v992_v25 = vadd.f32 %v1917_v11, %v2665_v54  ;;  %v929_v15 = vpop.f32.mrb[19].mxu1  ;;  %v1007_v18 = vmax.f32 %v991_v51, 0.0 }
 0x321   : > { %v990_v16 = vadd.f32 %v929_v15, %v2670_v12  ;;  %v1005_v30 = vmax.f32 %v989_v58, 0.0 }
 0x322   : > { %v1008_v23 = vmax.f32 %v992_v25, 0.0  ;;  %v2696_v25 = vadd.f32 %v2652_v14, %v2586_v61  ;;  %v2710_v61 = vadd.f32 %v2652_v14, %v2579_v55 }
 0x323   : > { %v1006_v31 = vmax.f32 %v990_v16, 0.0  ;;  %v2700_v16 = vadd.f32 %v2652_v14, %v2574_v52 }
 0x324   : > { %v1022_v32 = vpack.c.bf16 %v1008_v23, %v1007_v18 }
 0x325   : > { %v1021_v59 = vpack.c.bf16 %v1006_v31, %v1005_v30  ;;  %v1920_v60 = vpop.f32.mrb[20].mxu1  ;;  %v2705_v30 = vadd.f32 %v2652_v14, %v2591_v0 }
 0x326   : > { %v995_v33 = vadd.f32 %v1920_v60, %v2676_v28  ;;  %v942_v63 = vpop.f32.mrb[21].mxu1 }
 0x327   : > { %v993_v2 = vadd.f32 %v942_v63, %v2680_v19  ;;  %v1921_v3 = vpop.f32.mrb[22].mxu1  ;;  %1930 = vmatprep.subr.bf16.mxu0 %v1021_v59 }
 0x328   : > { %v996_v4 = vadd.f32 %v1921_v3, %v2685_v40  ;;  %v945_v48 = vpop.f32.mrb[23].mxu1  ;;  %1931 = vmatpush3.bf16.msra.mxu0 %v1021_v59  ;;  %v1011_v51 = vmax.f32 %v995_v33, 0.0 }
 0x329   : > { %v994_v34 = vadd.f32 %v945_v48, %v2690_v43  ;;  %1932 = vmatprep.subr.bf16.mxu0 %v1022_v32  ;;  %v1009_v58 = vmax.f32 %v993_v2, 0.0 }
 0x32a   : > { %v1012_v8 = vmax.f32 %v996_v4, 0.0  ;;  %v2716_v4 = vadd.f32 %v2652_v14, %v2610_v21  ;;  %v2730_v21 = vadd.f32 %v2652_v14, %v2603_v9 }
 0x32b   : > { %v1010_v46 = vmax.f32 %v994_v34, 0.0  ;;  %v2720_v34 = vadd.f32 %v2652_v14, %v2598_v6 }
 0x32c   : > { %v1024_v11 = vpack.c.bf16 %v1012_v8, %v1011_v51  ;;  %1933 = vmatpush3.bf16.msra.mxu0 %v1022_v32 }
 0x32d   : > { %v1023_v15 = vpack.c.bf16 %v1010_v46, %v1009_v58  ;;  %v1924_v37 = vpop.f32.mrb[24].mxu1  ;;  %v2725_v58 = vadd.f32 %v2652_v14, %v2615_v24 }
 0x32e   : > { %v999_v18 = vadd.f32 %v1924_v37, %v2696_v25  ;;  %v958_v23 = vpop.f32.mrb[25].mxu1 }
 0x32f   : > { %v997_v31 = vadd.f32 %v958_v23, %v2700_v16  ;;  %v1925_v32 = vpop.f32.mrb[26].mxu1  ;;  %1934 = vmatprep.subr.bf16.mxu0 %v1023_v15 }
 0x330   : > { %v1000_v59 = vadd.f32 %v1925_v32, %v2705_v30  ;;  %v961_v60 = vpop.f32.mrb[27].mxu1  ;;  %1935 = vmatpush3.bf16.msra.mxu0 %v1023_v15  ;;  %v1015_v33 = vmax.f32 %v999_v18, 0.0 }
 0x331   : > { %v998_v52 = vadd.f32 %v961_v60, %v2710_v61  ;;  %1936 = vmatprep.subr.bf16.mxu0 %v1024_v11  ;;  %v1013_v2 = vmax.f32 %v997_v31, 0.0 }
 0x332   : > { %v1016_v63 = vmax.f32 %v1000_v59, 0.0 }
 0x333   : > { %v1014_v0 = vmax.f32 %v998_v52, 0.0 }
 0x334   : > { %v1026_v3 = vpack.c.bf16 %v1016_v63, %v1015_v33  ;;  %1937 = vmatpush3.bf16.msra.mxu0 %v1024_v11 }
 0x335   : > { %v1025_v48 = vpack.c.bf16 %v1014_v0, %v1013_v2  ;;  %v1928_v55 = vpop.f32.mrb[28].mxu1 }
 0x336   : > { %v1003_v51 = vadd.f32 %v1928_v55, %v2716_v4  ;;  %v974_v8 = vpop.f32.mrb[29].mxu1 }
 0x337   : > { %v1001_v46 = vadd.f32 %v974_v8, %v2720_v34  ;;  %v1929_v11 = vpop.f32.mrb[30].mxu1  ;;  %1938 = vmatprep.subr.bf16.mxu0 %v1025_v48 }
 0x338   : > { %v1004_v15 = vadd.f32 %v1929_v11, %v2725_v58  ;;  %v977_v37 = vpop.f32.mrb[31].mxu1  ;;  %1939 = vmatpush3.bf16.msra.mxu0 %v1025_v48  ;;  %v1019_v18 = vmax.f32 %v1003_v51, 0.0 }
 0x339   : > { %v1002_v6 = vadd.f32 %v977_v37, %v2730_v21  ;;  %1940 = vmatprep.subr.bf16.mxu0 %v1026_v3  ;;  %v1017_v31 = vmax.f32 %v1001_v46, 0.0 }
 0x33a   : > { %v1020_v23 = vmax.f32 %v1004_v15, 0.0 }
 0x33b   : > { %v1018_v24 = vmax.f32 %v1002_v6, 0.0 }
 0x33c   : > { %v1028_v32 = vpack.c.bf16 %v1020_v23, %v1019_v18  ;;  %1941 = vmatpush3.bf16.msra.mxu0 %v1026_v3 }
 0x33d   : > { %v1027_v59 = vpack.c.bf16 %v1018_v24, %v1017_v31 }
 0x33f   : > { %1942 = vmatprep.subr.bf16.mxu0 %v1027_v59 }
 0x340   : > { %1943 = vmatpush3.bf16.msra.mxu0 %v1027_v59  ;;  %v2742_v59 = vld [vmem:[#allocation5] sm:$0xff]  }
 0x341   : > { %1944 = vmatprep.subr.bf16.mxu0 %v1028_v32  ;;  %2058 = vmatprep.subr.bf16.mxu1 %v2742_v59 }
 0x344   : > { %1945 = vmatpush3.bf16.msra.mxu0 %v1028_v32 }
 0x347   : > { %1947 = vmatmul.mubr.bf16.vlgmr.msra.gmra.mrb[32].mxu0 %v2622_v36 }
 0x348   : > { %1950 = vmatprep.mubr.bf16.mxu0 %v2625_v39 }
 0x34f   : > { %1951 = vmatmul.mubr.bf16.gmra.mrb[36].mxu0 %v2630_v41 }
 0x350   : > { %1954 = vmatprep.mubr.bf16.mxu0 %v2633_v42 }
 0x357   : > { %1955 = vmatmul.mubr.bf16.gmra.mrb[40].mxu0 %v2638_v49 }
 0x358   : > { %1958 = vmatprep.mubr.bf16.mxu0 %v2641_v50 }
 0x35f   : > { %1959 = vmatmul.mubr.bf16.gmra.mrb[44].mxu0 %v2646_v57 }
 0x360   : > { %2010 = vmatprep.mubr.bf16.mxu0 %v2516_v13 }
 0x41a   : > { %v1948_v9 = vpop.f32.mrb[32].mxu0 }
 0x41b   : > { %v1063_v14 = vpop.f32.mrb[33].mxu0 }
 0x41c   : > { %v1949_v60 = vpop.f32.mrb[34].mxu0 }
 0x41d   : > { %v1127_v52 = vpack.c.bf16 %v1949_v60, %v1948_v9  ;;  %v1066_v33 = vpop.f32.mrb[35].mxu0  ;;  %v2744_v9 = vld [vmem:[#allocation5 + $0x8] sm:$0xff]   ;;  %v2753_v60 = vld [vmem:[#allocation5 + $0x18] sm:$0xff]  }
 0x41e   : > { %v1126_v63 = vpack.c.bf16 %v1066_v33, %v1063_v14  ;;  %v2749_v14 = vld [vmem:[#allocation5 + $0x10] sm:$0xff]   ;;  %v2761_v33 = vld [vmem:[#allocation5 + $0x28] sm:$0xff]  }
 0x420   : > { %1978 = vmatprep.mubr.bf16.mxu1 %v1126_v63  ;;  %v2765_v63 = vld [vmem:[#allocation5 + $0x30] sm:$0xff]  }
 0x421   : > { %1979 = vmatmul.mubr.bf16.vlgmr.msra.gmra.mrb[32].mxu1 %v1127_v52  ;;  %v2757_v52 = vld [vmem:[#allocation5 + $0x20] sm:$0xff]  }
 0x422   : > { %v1952_v2 = vpop.f32.mrb[36].mxu0  ;;  %2066 = vmatpush3.bf16.msra.mxu1 %v2742_v59 }
 0x423   : > { %v1079_v0 = vpop.f32.mrb[37].mxu0  ;;  %2059 = vmatprep.subr.bf16.mxu1 %v2744_v9 }
 0x424   : > { %v1953_v3 = vpop.f32.mrb[38].mxu0 }
 0x425   : > { %v1129_v48 = vpack.c.bf16 %v1953_v3, %v1952_v2  ;;  %v1082_v55 = vpop.f32.mrb[39].mxu0 }
 0x426   : > { %v1128_v51 = vpack.c.bf16 %v1082_v55, %v1079_v0  ;;  %2067 = vmatpush3.bf16.msra.mxu1 %v2744_v9 }
 0x427   : > { %2060 = vmatprep.subr.bf16.mxu1 %v2749_v14 }
 0x428   : > { %1982 = vmatprep.mubr.bf16.mxu1 %v1128_v51 }
 0x429   : > { %1983 = vmatmul.mubr.bf16.gmra.mrb[36].mxu1 %v1129_v48 }
 0x42a   : > { %v1956_v8 = vpop.f32.mrb[40].mxu0  ;;  %2068 = vmatpush3.bf16.msra.mxu1 %v2749_v14 }
 0x42b   : > { %v1095_v46 = vpop.f32.mrb[41].mxu0  ;;  %2061 = vmatprep.subr.bf16.mxu1 %v2753_v60 }
 0x42c   : > { %v1957_v11 = vpop.f32.mrb[42].mxu0 }
 0x42d   : > { %v1131_v13 = vpack.c.bf16 %v1957_v11, %v1956_v8  ;;  %v1098_v15 = vpop.f32.mrb[43].mxu0 }
 0x42e   : > { %v1130_v37 = vpack.c.bf16 %v1098_v15, %v1095_v46  ;;  %2069 = vmatpush3.bf16.msra.mxu1 %v2753_v60 }
 0x42f   : > { %2062 = vmatprep.subr.bf16.mxu1 %v2757_v52 }
 0x430   : > { %1986 = vmatprep.mubr.bf16.mxu1 %v1130_v37 }
 0x431   : > { %1987 = vmatmul.mubr.bf16.gmra.mrb[40].mxu1 %v1131_v13 }
 0x432   : > { %v1960_v6 = vpop.f32.mrb[44].mxu0  ;;  %2070 = vmatpush3.bf16.msra.mxu1 %v2757_v52 }
 0x433   : > { %v1111_v18 = vpop.f32.mrb[45].mxu0  ;;  %2063 = vmatprep.subr.bf16.mxu1 %v2761_v33 }
 0x434   : > { %v1961_v23 = vpop.f32.mrb[46].mxu0 }
 0x435   : > { %v1133_v31 = vpack.c.bf16 %v1961_v23, %v1960_v6  ;;  %v1114_v24 = vpop.f32.mrb[47].mxu0 }
 0x436   : > { %v1132_v32 = vpack.c.bf16 %v1114_v24, %v1111_v18  ;;  %2071 = vmatpush3.bf16.msra.mxu1 %v2761_v33 }
 0x437   : > { %2064 = vmatprep.subr.bf16.mxu1 %v2765_v63 }
 0x438   : > { %1990 = vmatprep.mubr.bf16.mxu1 %v1132_v32 }
 0x439   : > { %1991 = vmatmul.mubr.bf16.gmra.mrb[44].mxu1 %v1133_v31 }
 0x43a   : > { %2072 = vmatpush3.bf16.msra.mxu1 %v2765_v63 }
 0x4f4   : > { %v1980_v2 = vpop.f32.mrb[32].mxu1 }
 0x4f5   : > { %v1233_v0 = vadd.f32 %v1980_v2, %v2656_v45  ;;  %v1168_v3 = vpop.f32.mrb[33].mxu1 }
 0x4f6   : > { %v1231_v48 = vadd.f32 %v1168_v3, %v2660_v5  ;;  %v1981_v55 = vpop.f32.mrb[34].mxu1 }
 0x4f7   : > { %v1234_v51 = vadd.f32 %v1981_v55, %v2665_v54  ;;  %v1171_v8 = vpop.f32.mrb[35].mxu1  ;;  %v1249_v11 = vmax.f32 %v1233_v0, 0.0 }
 0x4f8   : > { %v1232_v46 = vadd.f32 %v1171_v8, %v2670_v12  ;;  %v1247_v15 = vmax.f32 %v1231_v48, 0.0 }
 0x4f9   : > { %v1250_v13 = vmax.f32 %v1234_v51, 0.0 }
 0x4fa   : > { %v1248_v37 = vmax.f32 %v1232_v46, 0.0 }
 0x4fb   : > { %v1264_v6 = vpack.c.bf16 %v1250_v13, %v1249_v11 }
 0x4fc   : > { %v1263_v18 = vpack.c.bf16 %v1248_v37, %v1247_v15  ;;  %v1984_v23 = vpop.f32.mrb[36].mxu1 }
 0x4fd   : > { %v1237_v31 = vadd.f32 %v1984_v23, %v2676_v28  ;;  %v1184_v24 = vpop.f32.mrb[37].mxu1 }
 0x4fe   : > { %v1235_v45 = vadd.f32 %v1184_v24, %v2680_v19  ;;  %v1985_v32 = vpop.f32.mrb[38].mxu1  ;;  %1994 = vmatprep.subr.bf16.mxu0 %v1263_v18 }
 0x4ff   : > { %v1238_v5 = vadd.f32 %v1985_v32, %v2685_v40  ;;  %v1187_v54 = vpop.f32.mrb[39].mxu1  ;;  %1995 = vmatpush3.bf16.msra.mxu0 %v1263_v18  ;;  %v1253_v2 = vmax.f32 %v1237_v31, 0.0 }
 0x500   : > { %v1236_v12 = vadd.f32 %v1187_v54, %v2690_v43  ;;  %1996 = vmatprep.subr.bf16.mxu0 %v1264_v6  ;;  %v1251_v3 = vmax.f32 %v1235_v45, 0.0 }
 0x501   : > { %v1254_v0 = vmax.f32 %v1238_v5, 0.0 }
 0x502   : > { %v1252_v48 = vmax.f32 %v1236_v12, 0.0 }
 0x503   : > { %v1266_v55 = vpack.c.bf16 %v1254_v0, %v1253_v2  ;;  %1997 = vmatpush3.bf16.msra.mxu0 %v1264_v6 }
 0x504   : > { %v1265_v51 = vpack.c.bf16 %v1252_v48, %v1251_v3  ;;  %v1988_v28 = vpop.f32.mrb[40].mxu1 }
 0x505   : > { %v1241_v8 = vadd.f32 %v1988_v28, %v2696_v25  ;;  %v1200_v19 = vpop.f32.mrb[41].mxu1 }
 0x506   : > { %v1239_v46 = vadd.f32 %v1200_v19, %v2700_v16  ;;  %v1989_v11 = vpop.f32.mrb[42].mxu1  ;;  %1998 = vmatprep.subr.bf16.mxu0 %v1265_v51 }
 0x507   : > { %v1242_v40 = vadd.f32 %v1989_v11, %v2705_v30  ;;  %v1203_v13 = vpop.f32.mrb[43].mxu1  ;;  %1999 = vmatpush3.bf16.msra.mxu0 %v1265_v51  ;;  %v1257_v15 = vmax.f32 %v1241_v8, 0.0 }
 0x508   : > { %v1240_v43 = vadd.f32 %v1203_v13, %v2710_v61  ;;  %2000 = vmatprep.subr.bf16.mxu0 %v1266_v55  ;;  %v1255_v18 = vmax.f32 %v1239_v46, 0.0  ;;  %v2811_v13 = vld [vmem:[%s2924_s7] ss:$0 sm:$0xff] }
 0x509   : > { %v1258_v37 = vmax.f32 %v1242_v40, 0.0 }
 0x50a   : > { %v1256_v6 = vmax.f32 %v1240_v43, 0.0 }
 0x50b   : > { %v1268_v23 = vpack.c.bf16 %v1258_v37, %v1257_v15  ;;  %2001 = vmatpush3.bf16.msra.mxu0 %v1266_v55 }
 0x50c   : > { %v1267_v31 = vpack.c.bf16 %v1256_v6, %v1255_v18  ;;  %v1992_v25 = vpop.f32.mrb[44].mxu1 }
 0x50d   : > { %v1245_v24 = vadd.f32 %v1992_v25, %v2716_v4  ;;  %v1216_v16 = vpop.f32.mrb[45].mxu1 }
 0x50e   : > { %v1243_v45 = vadd.f32 %v1216_v16, %v2720_v34  ;;  %v1993_v32 = vpop.f32.mrb[46].mxu1  ;;  %2002 = vmatprep.subr.bf16.mxu0 %v1267_v31 }
 0x50f   : > { %v1246_v30 = vadd.f32 %v1993_v32, %v2725_v58  ;;  %v1219_v5 = vpop.f32.mrb[47].mxu1  ;;  %2003 = vmatpush3.bf16.msra.mxu0 %v1267_v31  ;;  %v1261_v54 = vmax.f32 %v1245_v24, 0.0 }
 0x510   : > { %v1244_v61 = vadd.f32 %v1219_v5, %v2730_v21  ;;  %2004 = vmatprep.subr.bf16.mxu0 %v1268_v23  ;;  %v1259_v2 = vmax.f32 %v1243_v45, 0.0 }
 0x511   : > { %v1262_v12 = vmax.f32 %v1246_v30, 0.0 }
 0x512   : > { %v1260_v0 = vmax.f32 %v1244_v61, 0.0 }
 0x513   : > { %v1270_v3 = vpack.c.bf16 %v1262_v12, %v1261_v54  ;;  %2005 = vmatpush3.bf16.msra.mxu0 %v1268_v23 }
 0x514   : > { %v1269_v48 = vpack.c.bf16 %v1260_v0, %v1259_v2 }
 0x516   : > { %2006 = vmatprep.subr.bf16.mxu0 %v1269_v48 }
 0x517   : > { %2007 = vmatpush3.bf16.msra.mxu0 %v1269_v48 }
 0x518   : > { %2008 = vmatprep.subr.bf16.mxu0 %v1270_v3 }
 0x51b   : > { %2009 = vmatpush3.bf16.msra.mxu0 %v1270_v3 }
 0x51c   : > { %2026 = vmatprep.subr.bf16.mxu0 %v2742_v59 }
 0x51e   : > { %2011 = vmatmul.mubr.bf16.vlgmr.msra.gmra.mrb[48].mxu0 %v2622_v36  ;;  %v2176_v36 = vld [vmem:[#allocation5 + $0x38] sm:$0xff]  }
 0x51f   : > { %2014 = vmatprep.mubr.bf16.mxu0 %v2625_v39  ;;  %2027 = vmatpush3.bf16.msra.mxu0 %v2742_v59 }
 0x520   : > { %2028 = vmatprep.subr.bf16.mxu0 %v2744_v9  ;;  %2065 = vmatprep.subr.bf16.mxu1 %v2176_v36 }
 0x521   : > { %2073 = vmatpush3.bf16.msra.mxu1 %v2176_v36 }
 0x523   : > { %2029 = vmatpush3.bf16.msra.mxu0 %v2744_v9 }
 0x524   : > { %2030 = vmatprep.subr.bf16.mxu0 %v2749_v14 }
 0x526   : > { %2015 = vmatmul.mubr.bf16.gmra.mrb[52].mxu0 %v2630_v41 }
 0x527   : > { %2018 = vmatprep.mubr.bf16.mxu0 %v2633_v42  ;;  %2031 = vmatpush3.bf16.msra.mxu0 %v2749_v14 }
 0x528   : > { %2032 = vmatprep.subr.bf16.mxu0 %v2753_v60 }
 0x52b   : > { %2033 = vmatpush3.bf16.msra.mxu0 %v2753_v60 }
 0x52c   : > { %2034 = vmatprep.subr.bf16.mxu0 %v2757_v52 }
 0x52e   : > { %2019 = vmatmul.mubr.bf16.gmra.mrb[56].mxu0 %v2638_v49 }
 0x52f   : > { %2022 = vmatprep.mubr.bf16.mxu0 %v2641_v50  ;;  %2035 = vmatpush3.bf16.msra.mxu0 %v2757_v52 }
 0x530   : > { %2036 = vmatprep.subr.bf16.mxu0 %v2761_v33 }
 0x533   : > { %2037 = vmatpush3.bf16.msra.mxu0 %v2761_v33 }
 0x534   : > { %2038 = vmatprep.subr.bf16.mxu0 %v2765_v63 }
 0x536   : > { %2023 = vmatmul.mubr.bf16.gmra.mrb[60].mxu0 %v2646_v57 }
 0x537   : > { %2039 = vmatpush3.bf16.msra.mxu0 %v2765_v63 }
 0x538   : > { %2040 = vmatprep.subr.bf16.mxu0 %v2176_v36 }
 0x53b   : > { %2041 = vmatpush3.bf16.msra.mxu0 %v2176_v36 }
 0x5f1   : > { %v2012_v39 = vpop.f32.mrb[48].mxu0 }
 0x5f2   : > { %v1305_v41 = vpop.f32.mrb[49].mxu0 }
 0x5f3   : > { %v2013_v42 = vpop.f32.mrb[50].mxu0 }
 0x5f4   : > { %v1369_v49 = vpack.c.bf16 %v2013_v42, %v2012_v39  ;;  %v1308_v50 = vpop.f32.mrb[51].mxu0 }
 0x5f5   : > { %v1368_v4 = vpack.c.bf16 %v1308_v50, %v1305_v41 }
 0x5f7   : > { %2042 = vmatprep.mubr.bf16.mxu0 %v1368_v4 }
 0x5f8   : > { %2043 = vmatmul.mubr.bf16.vlgmr.msra.gmra.mrb[64].mxu0 %v1369_v49 }
 0x5f9   : > { %v2016_v34 = vpop.f32.mrb[52].mxu0 }
 0x5fa   : > { %v1321_v58 = vpop.f32.mrb[53].mxu0 }
 0x5fb   : > { %v2017_v21 = vpop.f32.mrb[54].mxu0 }
 0x5fc   : > { %v1371_v59 = vpack.c.bf16 %v2017_v21, %v2016_v34  ;;  %v1324_v57 = vpop.f32.mrb[55].mxu0 }
 0x5fd   : > { %v1370_v9 = vpack.c.bf16 %v1324_v57, %v1321_v58 }
 0x5ff   : > { %2046 = vmatprep.mubr.bf16.mxu1 %v1370_v9 }
 0x600   : > { %2047 = vmatmul.mubr.bf16.vlgmr.msra.gmra.mrb[48].mxu1 %v1371_v59 }
 0x601   : > { %v2020_v14 = vpop.f32.mrb[56].mxu0 }
 0x602   : > { %v1337_v60 = vpop.f32.mrb[57].mxu0 }
 0x603   : > { %v2021_v52 = vpop.f32.mrb[58].mxu0 }
 0x604   : > { %v1373_v33 = vpack.c.bf16 %v2021_v52, %v2020_v14  ;;  %v1340_v63 = vpop.f32.mrb[59].mxu0 }
 0x605   : > { %v1372_v55 = vpack.c.bf16 %v1340_v63, %v1337_v60 }
 0x607   : > { %2050 = vmatprep.mubr.bf16.mxu1 %v1372_v55 }
 0x608   : > { %2051 = vmatmul.mubr.bf16.gmra.mrb[52].mxu1 %v1373_v33 }
 0x609   : > { %v2024_v51 = vpop.f32.mrb[60].mxu0 }
 0x60a   : > { %v1353_v28 = vpop.f32.mrb[61].mxu0 }
 0x60b   : > { %v2025_v8 = vpop.f32.mrb[62].mxu0 }
 0x60c   : > { %v1375_v19 = vpack.c.bf16 %v2025_v8, %v2024_v51  ;;  %v1356_v46 = vpop.f32.mrb[63].mxu0 }
 0x60d   : > { %v1374_v11 = vpack.c.bf16 %v1356_v46, %v1353_v28 }
 0x60f   : > { %2054 = vmatprep.mubr.bf16.mxu1 %v1374_v11 }
 0x610   : > { %2055 = vmatmul.mubr.bf16.gmra.mrb[56].mxu1 %v1375_v19 }
 0x6cb   : > { %v2044_v40 = vpop.f32.mrb[64].mxu0 }
 0x6cc   : > { %v1523_v43 = vadd.f32 %v2044_v40, %v2540_v26  ;;  %v1458_v15 = vpop.f32.mrb[65].mxu0 }
 0x6cd   : > { %v1521_v37 = vadd.f32 %v1458_v15, %v2528_v17  ;;  %v2045_v18 = vpop.f32.mrb[66].mxu0 }
 0x6ce   : > { %v1546_v6 = vadd.f32 %v2811_v13, %v1523_v43  ;;  %v1524_v23 = vadd.f32 %v2045_v18, %v2545_v29  ;;  %v1461_v31 = vpop.f32.mrb[67].mxu0 }
 0x6cf   : > { %v1544_v25 = vadd.f32 %v2811_v13, %v1521_v37  ;;  %v1522_v24 = vadd.f32 %v1461_v31, %v2533_v20 }
 0x6d0   : > { %v1562_v16 = vmax.f32 %v1546_v6, 0.0  ;;  %v1547_v45 = vadd.f32 %v2811_v13, %v1524_v23 }
 0x6d1   : > { %v1560_v32 = vmax.f32 %v1544_v25, 0.0  ;;  %v1545_v30 = vadd.f32 %v2811_v13, %v1522_v24 }
 0x6d2   : > { %1578 = vst [vmem:[%s2823_s12 + $0x10] sm:$0xff] %v1562_v16  ;;  %v1563_v17 = vmax.f32 %v1547_v45, 0.0 }
 0x6d3   : > { %1576 = vst [vmem:[%s2823_s12] sm:$0xff] %v1560_v32  ;;  %v1561_v26 = vmax.f32 %v1545_v30, 0.0  ;;  %v2048_v29 = vpop.f32.mrb[48].mxu1 }
 0x6d4   : > { %1579 = vst [vmem:[%s2823_s12 + $0x18] sm:$0xff] %v1563_v17  ;;  %v1527_v20 = vadd.f32 %v2048_v29, %v2564_v44  ;;  %v1474_v5 = vpop.f32.mrb[49].mxu1 }
 0x6d5   : > { %1577 = vst [vmem:[%s2823_s12 + $0x8] sm:$0xff] %v1561_v26  ;;  %v1525_v61 = vadd.f32 %v1474_v5, %v2552_v35  ;;  %v2049_v54 = vpop.f32.mrb[50].mxu1 }
 0x6d6   : > { %v1550_v12 = vadd.f32 %v2811_v13, %v1527_v20  ;;  %v1528_v2 = vadd.f32 %v2049_v54, %v2569_v47  ;;  %v1477_v0 = vpop.f32.mrb[51].mxu1 }
 0x6d7   : > { %v1548_v3 = vadd.f32 %v2811_v13, %v1525_v61  ;;  %v1526_v48 = vadd.f32 %v1477_v0, %v2557_v38 }
 0x6d8   : > { %v1566_v36 = vmax.f32 %v1550_v12, 0.0  ;;  %v1551_v44 = vadd.f32 %v2811_v13, %v1528_v2 }
 0x6d9   : > { %v1564_v39 = vmax.f32 %v1548_v3, 0.0  ;;  %v1549_v41 = vadd.f32 %v2811_v13, %v1526_v48 }
 0x6da   : > { %1582 = vst [vmem:[%s2823_s12 + $0x30] sm:$0xff] %v1566_v36  ;;  %v1567_v35 = vmax.f32 %v1551_v44, 0.0 }
 0x6db   : > { %1580 = vst [vmem:[%s2823_s12 + $0x20] sm:$0xff] %v1564_v39  ;;  %v1565_v42 = vmax.f32 %v1549_v41, 0.0  ;;  %v2052_v49 = vpop.f32.mrb[52].mxu1 }
 0x6dc   : > { %1583 = vst [vmem:[%s2823_s12 + $0x38] sm:$0xff] %v1567_v35  ;;  %v1531_v47 = vadd.f32 %v2052_v49, %v2588_v62  ;;  %v1490_v50 = vpop.f32.mrb[53].mxu1 }
 0x6dd   : > { %1581 = vst [vmem:[%s2823_s12 + $0x28] sm:$0xff] %v1565_v42  ;;  %v1529_v38 = vadd.f32 %v1490_v50, %v2576_v53  ;;  %v2053_v4 = vpop.f32.mrb[54].mxu1 }
 0x6de   : > { %v1554_v34 = vadd.f32 %v2811_v13, %v1531_v47  ;;  %v1532_v58 = vadd.f32 %v2053_v4, %v2593_v1  ;;  %v1493_v21 = vpop.f32.mrb[55].mxu1 }
 0x6df   : > { %v1552_v59 = vadd.f32 %v2811_v13, %v1529_v38  ;;  %v1530_v57 = vadd.f32 %v1493_v21, %v2581_v56 }
 0x6e0   : > { %v1570_v9 = vmax.f32 %v1554_v34, 0.0  ;;  %v1555_v62 = vadd.f32 %v2811_v13, %v1532_v58 }
 0x6e1   : > { %v1568_v14 = vmax.f32 %v1552_v59, 0.0  ;;  %v1553_v60 = vadd.f32 %v2811_v13, %v1530_v57 }
 0x6e2   : > { %1586 = vst [vmem:[%s2823_s12 + $0x50] sm:$0xff] %v1570_v9  ;;  %v1571_v53 = vmax.f32 %v1555_v62, 0.0 }
 0x6e3   : > { %1584 = vst [vmem:[%s2823_s12 + $0x40] sm:$0xff] %v1568_v14  ;;  %v1569_v52 = vmax.f32 %v1553_v60, 0.0  ;;  %v2056_v33 = vpop.f32.mrb[56].mxu1 }
 0x6e4   : > { %1587 = vst [vmem:[%s2823_s12 + $0x58] sm:$0xff] %v1571_v53  ;;  %v1535_v1 = vadd.f32 %v2056_v33, %v2612_v22  ;;  %v1506_v63 = vpop.f32.mrb[57].mxu1 }
 0x6e5   : > { %1585 = vst [vmem:[%s2823_s12 + $0x48] sm:$0xff] %v1569_v52  ;;  %v1533_v56 = vadd.f32 %v1506_v63, %v2600_v7  ;;  %v2057_v55 = vpop.f32.mrb[58].mxu1 }
 0x6e6   : > { %v1558_v51 = vadd.f32 %v2811_v13, %v1535_v1  ;;  %v1536_v28 = vadd.f32 %v2057_v55, %v2617_v27  ;;  %v1509_v8 = vpop.f32.mrb[59].mxu1 }
 0x6e7   : > { %v1556_v19 = vadd.f32 %v2811_v13, %v1533_v56  ;;  %v1534_v46 = vadd.f32 %v1509_v8, %v2605_v10 }
 0x6e8   : > { %v1574_v22 = vmax.f32 %v1558_v51, 0.0  ;;  %v1559_v7 = vadd.f32 %v2811_v13, %v1536_v28 }
 0x6e9   : > { %v1572_v11 = vmax.f32 %v1556_v19, 0.0  ;;  %v1557_v40 = vadd.f32 %v2811_v13, %v1534_v46 }
 0x6ea   : > { %1590 = vst [vmem:[%s2823_s12 + $0x70] sm:$0xff] %v1574_v22  ;;  %v1575_v43 = vmax.f32 %v1559_v7, 0.0 }
 0x6eb   : > { %1588 = vst [vmem:[%s2823_s12 + $0x60] sm:$0xff] %v1572_v11  ;;  %v1573_v10 = vmax.f32 %v1557_v40, 0.0 }
 0x6ec   : > { %1591 = vst [vmem:[%s2823_s12 + $0x78] sm:$0xff] %v1575_v43 }
 0x6ed   : > { %1589 = vst [vmem:[%s2823_s12 + $0x68] sm:$0xff] %v1573_v10 }
 0x6ee   : > { %2246 = shalt.err (!%p2243_p11)
}
 0x6ef   : > { %s2247_s17 = scalar_lea.hbm %s2867_s14, 2048  ;;  %s2251_s26 = scalar_lea.hbm %s2925_s8, 4096 }
 0x6f0   : > { %p2248_p13 = scmp.ne.s32.totalorder %s2867_s14, %s2247_s17  ;;  %p2252_p6 = scmp.lt.u32.totalorder %s2867_s14, %s2925_s8 }
 0x6f1   : > { %p2253_p9 = scmp.lt.u32.totalorder %s2251_s26, %s2247_s17  ;;  %p2255_p12 = scmp.lt.u32.totalorder %s2247_s17, %s2867_s14 }
 0x6f2   : > { %p2249_p5 = pnand %p2248_p13, %p2941_p1 }
 0x6f3   : > { %p2254_p10 = por %p2253_p9, %p2252_p6 }
 0x6f4   : > { %p2250_p0 = pneg %p2249_p5 }
 0x6f5   : > { %p2256_p2 = por %p2255_p12, %p2254_p10 }
 0x6f7   : > { %p2257_p3 = pnand %p2256_p2, %p2250_p0 }
 0x6f9   : > { %2260 = shalt.err (!%p2257_p3)
}
 0x6fa   : > { %s2311_s13 = smov 128   ;;  %s2312_s19 = smov 8  }
 0x6fb   : > { %2082 = dma.vmem_to_hbm [thread:$0]  (%p2941_p1), %s2869_s18, 2048, %s2867_s14, %s2876_s9, %s2311_s13, %s2311_s13, %s2312_s19  }
 0x6fc PF: > { %p2099_p4 = scmp.ge.s32.totalorder %s2303_s30, 2  ;;  %s1621_s29 = sand.u32 1, %s2291_s27  }
 0x6fd   : > { %p2942_p7 = scmp.ne.s32.totalorder %s2933_s16, 0  ;;  %s1622_s22 = scalar_lea.sflag [#allocation4], %s1621_s29 }
 0x6ff   : > { %p2092_p8 = pnand %p2099_p4, %p2942_p7 }
 0x701   : > { %2286 = dma.done.wait (!%p2092_p8), %s1622_s22, 2048  }
 0x702   : > { %2288 = vsyncadd (!%p2092_p8), %s1622_s22, 4294965248  ;;  %s2943_s21 = sld [smem:[#allocation11_spill]]  ;;  %s2944_s29 = sld [smem:[#allocation12_spill]] }
 0x703   : > { %p20_p11 = scmp.ge.s32.totalorder %s2383_s11, 4   ;;  %s2945_s27 = smov %s2295_s28 }
 0x704   : > { %s2947_s30 = smov %s2383_s11 }
 0x705   :  { %22 = sbr.rel (!%p20_p11) target bundleno = 5 (0x5), region = 99 }
 0x708   : > { %s2946_s28 = smov %s2943_s21 }
 0x70c   :  { %1627 = vsyncpa [#allocation3], 1 }
 0x70d   :  { %1629 = vsyncpa [#allocation3 + $0x1], 1 }
 0x70e   :  { %1630 = vsyncpa [#allocation6], 1 }
 0x70f   :  { %1631 = vsyncpa [#allocation4], 1 }
 0x710   :  { %1633 = vsyncpa [#allocation4 + $0x1], 1 }

</bundles_post_ra>
